<compile_context>
chip_gen: v5e
topology: v5e:2x2
jax: 0.10.0
libtpu: 0.0.40
codegen_flags: <defaults>
</compile_context>

<pallas_src>
import functools

import jax
import jax.numpy as jnp
from jax.experimental import pallas as pl
from jax.experimental.pallas import tpu as pltpu

LANE = 128
MIN_TM = 16          # bf16 packs two rows per sublane -> keep tiles 16-row aligned
N_CLASSES = 10


def _round_up(n, m):
    return ((n + m - 1) // m) * m


def _pad_axis_to(a, target, axis):
    pad = target - a.shape[axis]
    if pad == 0:
        return a
    widths = [(0, 0)] * a.ndim
    widths[axis] = (0, pad)
    return jnp.pad(a, widths)  # zero padding -> semantics preserved


def mlp_kernel(x_ref, w1_ref, b1_ref, w2_ref, b2_ref, w3_ref, b3_ref, out_ref):
    # x arrives as raw f32; cast to bf16 on the VPU right before the MXU matmul.
    x = x_ref[...].astype(w1_ref.dtype)
    # Layer 1: Linear(784, u1) + ReLU. bf16 MXU matmul, f32 accumulation.
    h1 = jnp.dot(x, w1_ref[...], preferred_element_type=jnp.float32)
    h1 = jnp.maximum(h1 + b1_ref[...], 0.0)          # bias+ReLU on VPU (free under MXU)
    # Layer 2: Linear(u1, u2) + ReLU.
    h2 = jnp.dot(h1.astype(w2_ref.dtype), w2_ref[...],
                 preferred_element_type=jnp.float32)
    h2 = jnp.maximum(h2 + b2_ref[...], 0.0)
    # Layer 3: Linear(u2, 10) (out padded to 128 lanes -> unmasked stores).
    logits = jnp.dot(h2.astype(w3_ref.dtype), w3_ref[...],
                     preferred_element_type=jnp.float32)
    out_ref[...] = (logits + b3_ref[...]).astype(out_ref.dtype)


def prepare_params(params, compute_dtype=jnp.bfloat16):
    """One-time padding/casting of weights (hoisted out of the per-call forward).
    K=784 is NOT padded; feature dims are padded to 128 lanes (zero pad)."""
    w1, b1, w2, b2, w3, b3 = params
    U1 = w1.shape[1]
    U2 = w2.shape[1]
    N = w3.shape[1]
    U1p = _round_up(U1, LANE)
    U2p = _round_up(U2, LANE)
    Np = _round_up(N, LANE)                    # 10 -> 128

    w1_p = _pad_axis_to(w1, U1p, 1).astype(compute_dtype)
    b1_p = _pad_axis_to(b1, U1p, 1).astype(jnp.float32)
    w2_p = _pad_axis_to(_pad_axis_to(w2, U1p, 0), U2p, 1).astype(compute_dtype)
    b2_p = _pad_axis_to(b2, U2p, 1).astype(jnp.float32)
    w3_p = _pad_axis_to(_pad_axis_to(w3, U2p, 0), Np, 1).astype(compute_dtype)
    b3_p = _pad_axis_to(b3, Np, 1).astype(jnp.float32)
    return (w1_p, b1_p, w2_p, b2_p, w3_p, b3_p)


@functools.partial(jax.jit, static_argnames=("block_m", "n_out"))
def neural_network_forward(x, padded_params, *, block_m=2048, n_out=N_CLASSES):
    """x: (B, 28, 28) float32. padded_params from prepare_params().
    Returns logits (B, n_out) float32."""
    w1, b1, w2, b2, w3, b3 = padded_params
    B = x.shape[0]
    K = w1.shape[0]                            # 784 (unpadded)
    Np = w3.shape[1]                           # 128

    x_flat = x.reshape(B, K)                   # nn.Flatten (row-major, matches torch)

    # Adaptive batch tile: large enough to amortize per-step overhead, small
    # enough to avoid padding waste; >=2 grid steps (when possible) for v7x megacore.
    n_tiles = pl.cdiv(B, block_m)
    if B >= 2 * MIN_TM:
        n_tiles = max(n_tiles, 2)
    tm = _round_up(pl.cdiv(B, n_tiles), MIN_TM)
    grid = (pl.cdiv(B, tm),)

    # Weights / biases: same block every step -> VMEM-resident across the grid.
    resident = lambda arr: pl.BlockSpec(arr.shape, lambda i: (0, 0))

    out = pl.pallas_call(
        mlp_kernel,
        out_shape=jax.ShapeDtypeStruct((B, Np), jnp.bfloat16),
        grid=grid,
        in_specs=[
            pl.BlockSpec((tm, K), lambda i: (i, 0)),     # raw f32 x tile
            resident(w1), resident(b1),
            resident(w2), resident(b2),
            resident(w3), resident(b3),
        ],
        out_specs=pl.BlockSpec((tm, Np), lambda i: (i, 0)),
        compiler_params=pltpu.CompilerParams(
            dimension_semantics=("parallel",),           # shard batch tiles across TCs
            vmem_limit_bytes=48 * 1024 * 1024,           # > v5e 16 MiB default, < v7x 64 MiB
        ),
    )(x_flat, w1, b1, w2, b2, w3, b3)

    return out[:, :n_out].astype(jnp.float32)


def init_params(key, u1, u2):
    """torch.nn.Linear default init: U[-1/sqrt(fan_in), +1/sqrt(fan_in)].
    Weights stored as (in_features, out_features), bias as (1, out_features)."""
    dims = [(28 * 28, u1), (u1, u2), (u2, 10)]
    params = []
    for fan_in, fan_out in dims:
        key, kw, kb = jax.random.split(key, 3)
        bound = 1.0 / jnp.sqrt(jnp.float32(fan_in))
        w = jax.random.uniform(kw, (fan_in, fan_out), jnp.float32, -bound, bound)
        b = jax.random.uniform(kb, (1, fan_out), jnp.float32, -bound, bound)
        params += [w, b]
    return tuple(params)


def ref_forward(x, params, compute_dtype, round_output=False):
    """Plain-JAX reference. compute_dtype=bf16 + round_output=True mirrors the
    kernel math (bf16 matmul inputs, f32 accumulate, bf16 output store)."""
    w1, b1, w2, b2, w3, b3 = params
    xf = x.reshape(x.shape[0], -1).astype(compute_dtype)
    h1 = jnp.maximum(
        jnp.dot(xf, w1.astype(compute_dtype), preferred_element_type=jnp.float32) + b1, 0.0)
    h2 = jnp.maximum(
        jnp.dot(h1.astype(compute_dtype), w2.astype(compute_dtype),
                preferred_element_type=jnp.float32) + b2, 0.0)
    logits = jnp.dot(h2.astype(compute_dtype), w3.astype(compute_dtype),
                     preferred_element_type=jnp.float32) + b3
    if round_output:
        logits = logits.astype(jnp.bfloat16).astype(jnp.float32)
    return logits


if __name__ == "__main__":
    u1, u2 = 128, 64
    batch = 8

    key = jax.random.PRNGKey(0)
    key, kx = jax.random.split(key)
    x = jax.random.normal(kx, (batch, 28, 28), jnp.float32)
    params = init_params(key, u1, u2)
    padded_params = jax.tree_util.tree_map(
        jax.block_until_ready, prepare_params(params))     # one-time pad/cast

    # Small-batch run (single grid step, partial block handled by masking).
    logits = jax.block_until_ready(neural_network_forward(x, padded_params))
    assert logits.shape == (batch, 10)
    ref = ref_forward(x, params, jnp.bfloat16, round_output=True)
    assert jnp.allclose(logits, ref, atol=1e-2, rtol=1e-2), "small-batch mismatch"
    # Loose check against the full-f32 math of the original module (bf16 quantization error).
    ref_f32 = ref_forward(x, params, jnp.float32)
    assert jnp.allclose(logits, ref_f32, atol=5e-2, rtol=5e-2), "f32-reference drift too large"

    # Larger, non-multiple batch to exercise the multi-tile grid + masked last block.
    key, kx2 = jax.random.split(key)
    x_big = jax.random.normal(kx2, (384 + 40, 28, 28), jnp.float32)
    logits_big = jax.block_until_ready(neural_network_forward(x_big, padded_params))
    ref_big = ref_forward(x_big, params, jnp.bfloat16, round_output=True)
    assert logits_big.shape == (x_big.shape[0], 10)
    assert jnp.allclose(logits_big, ref_big, atol=1e-2, rtol=1e-2), "tiled-batch mismatch"

    print("KERNEL_OK")
</pallas_src>

<mosaic_0001>
module attributes {stable_mosaic.version = 11 : i64} {
  func.func @mlp_kernel(%arg0: i32, %arg1: memref<16x784xf32, #tpu.memory_space<vmem>>, %arg2: memref<784x128xbf16, #tpu.memory_space<vmem>>, %arg3: memref<1x128xf32, #tpu.memory_space<vmem>>, %arg4: memref<128x128xbf16, #tpu.memory_space<vmem>>, %arg5: memref<1x128xf32, #tpu.memory_space<vmem>>, %arg6: memref<128x128xbf16, #tpu.memory_space<vmem>>, %arg7: memref<1x128xf32, #tpu.memory_space<vmem>>, %arg8: memref<16x128xbf16, #tpu.memory_space<vmem>>) attributes {dimension_semantics = [#tpu.dimension_semantics<parallel>], iteration_bounds = array<i64: 1>, scalar_prefetch = 0 : i64, scratch_operands = 0 : i64, tpu.core_type = #tpu.core_type<tc>, window_params = [{transform_indices = @transform_0, window_bounds = array<i64: 16, 784>}, {pipeline_mode = #tpu.pipeline_mode<synchronous>, transform_indices = @transform_1, window_bounds = array<i64: 784, 128>}, {pipeline_mode = #tpu.pipeline_mode<synchronous>, transform_indices = @transform_2, window_bounds = array<i64: 1, 128>}, {pipeline_mode = #tpu.pipeline_mode<synchronous>, transform_indices = @transform_3, window_bounds = array<i64: 128, 128>}, {pipeline_mode = #tpu.pipeline_mode<synchronous>, transform_indices = @transform_4, window_bounds = array<i64: 1, 128>}, {pipeline_mode = #tpu.pipeline_mode<synchronous>, transform_indices = @transform_5, window_bounds = array<i64: 128, 128>}, {pipeline_mode = #tpu.pipeline_mode<synchronous>, transform_indices = @transform_6, window_bounds = array<i64: 1, 128>}, {transform_indices = @transform_7, window_bounds = array<i64: 16, 128>}]} {
    %c0 = arith.constant 0 : index
    %c0_0 = arith.constant 0 : index
    %0 = vector.load %arg1[%c0, %c0_0] : memref<16x784xf32, #tpu.memory_space<vmem>>, vector<16x784xf32>
    %1 = arith.truncf %0 : vector<16x784xf32> to vector<16x784xbf16>
    %c0_1 = arith.constant 0 : index
    %c0_2 = arith.constant 0 : index
    %2 = vector.load %arg2[%c0_1, %c0_2] : memref<784x128xbf16, #tpu.memory_space<vmem>>, vector<784x128xbf16>
    %cst = arith.constant dense<0.000000e+00> : vector<16x128xf32>
    %3 = tpu.matmul %1, %2, %cst {dimension_numbers = #tpu.dot_dimension_numbers<[1], [0], [0], [1], [0, 0, 1, 1], [], []>} : vector<16x784xbf16>, vector<784x128xbf16>, vector<16x128xf32> -> vector<16x128xf32>
    %c0_3 = arith.constant 0 : index
    %c0_4 = arith.constant 0 : index
    %4 = vector.load %arg3[%c0_3, %c0_4] : memref<1x128xf32, #tpu.memory_space<vmem>>, vector<1x128xf32>
    %5 = vector.broadcast %4 : vector<1x128xf32> to vector<16x128xf32>
    %6 = arith.addf %3, %5 : vector<16x128xf32>
    %cst_5 = arith.constant 0.000000e+00 : f32
    %7 = vector.broadcast %cst_5 : f32 to vector<16x128xf32>
    %8 = arith.maximumf %6, %7 : vector<16x128xf32>
    %9 = arith.truncf %8 : vector<16x128xf32> to vector<16x128xbf16>
    %c0_6 = arith.constant 0 : index
    %c0_7 = arith.constant 0 : index
    %10 = vector.load %arg4[%c0_6, %c0_7] : memref<128x128xbf16, #tpu.memory_space<vmem>>, vector<128x128xbf16>
    %cst_8 = arith.constant dense<0.000000e+00> : vector<16x128xf32>
    %11 = tpu.matmul %9, %10, %cst_8 {dimension_numbers = #tpu.dot_dimension_numbers<[1], [0], [0], [1], [0, 0, 1, 1], [], []>} : vector<16x128xbf16>, vector<128x128xbf16>, vector<16x128xf32> -> vector<16x128xf32>
    %c0_9 = arith.constant 0 : index
    %c0_10 = arith.constant 0 : index
    %12 = vector.load %arg5[%c0_9, %c0_10] : memref<1x128xf32, #tpu.memory_space<vmem>>, vector<1x128xf32>
    %13 = vector.broadcast %12 : vector<1x128xf32> to vector<16x128xf32>
    %14 = arith.addf %11, %13 : vector<16x128xf32>
    %cst_11 = arith.constant 0.000000e+00 : f32
    %15 = vector.broadcast %cst_11 : f32 to vector<16x128xf32>
    %16 = arith.maximumf %14, %15 : vector<16x128xf32>
    %17 = arith.truncf %16 : vector<16x128xf32> to vector<16x128xbf16>
    %c0_12 = arith.constant 0 : index
    %c0_13 = arith.constant 0 : index
    %18 = vector.load %arg6[%c0_12, %c0_13] : memref<128x128xbf16, #tpu.memory_space<vmem>>, vector<128x128xbf16>
    %cst_14 = arith.constant dense<0.000000e+00> : vector<16x128xf32>
    %19 = tpu.matmul %17, %18, %cst_14 {dimension_numbers = #tpu.dot_dimension_numbers<[1], [0], [0], [1], [0, 0, 1, 1], [], []>} : vector<16x128xbf16>, vector<128x128xbf16>, vector<16x128xf32> -> vector<16x128xf32>
    %c0_15 = arith.constant 0 : index
    %c0_16 = arith.constant 0 : index
    %20 = vector.load %arg7[%c0_15, %c0_16] : memref<1x128xf32, #tpu.memory_space<vmem>>, vector<1x128xf32>
    %21 = vector.broadcast %20 : vector<1x128xf32> to vector<16x128xf32>
    %22 = arith.addf %19, %21 : vector<16x128xf32>
    %23 = arith.truncf %22 : vector<16x128xf32> to vector<16x128xbf16>
    %c0_17 = arith.constant 0 : index
    %c0_18 = arith.constant 0 : index
    %24 = vector.load %arg8[%c0_17, %c0_18] : memref<16x128xbf16, #tpu.memory_space<vmem>>, vector<16x128xbf16>
    tpu.vector_store %arg8[%c0_17, %c0_18], %23 {strides = array<i32>} : memref<16x128xbf16, #tpu.memory_space<vmem>>, vector<16x128xbf16>,
    return
  }
  func.func @transform_0(%arg0: i32) -> (i32, i32) {
    %c0_i32 = arith.constant 0 : i32
    %c0_i32_0 = arith.constant 0 : i32
    return %arg0, %c0_i32 : i32, i32
  }
  func.func @transform_1(%arg0: i32) -> (i32, i32) {
    %c0_i32 = arith.constant 0 : i32
    %c0_i32_0 = arith.constant 0 : i32
    %c0_i32_1 = arith.constant 0 : i32
    return %c0_i32, %c0_i32_0 : i32, i32
  }
  func.func @transform_2(%arg0: i32) -> (i32, i32) {
    %c0_i32 = arith.constant 0 : i32
    %c0_i32_0 = arith.constant 0 : i32
    %c0_i32_1 = arith.constant 0 : i32
    return %c0_i32, %c0_i32_0 : i32, i32
  }
  func.func @transform_3(%arg0: i32) -> (i32, i32) {
    %c0_i32 = arith.constant 0 : i32
    %c0_i32_0 = arith.constant 0 : i32
    %c0_i32_1 = arith.constant 0 : i32
    return %c0_i32, %c0_i32_0 : i32, i32
  }
  func.func @transform_4(%arg0: i32) -> (i32, i32) {
    %c0_i32 = arith.constant 0 : i32
    %c0_i32_0 = arith.constant 0 : i32
    %c0_i32_1 = arith.constant 0 : i32
    return %c0_i32, %c0_i32_0 : i32, i32
  }
  func.func @transform_5(%arg0: i32) -> (i32, i32) {
    %c0_i32 = arith.constant 0 : i32
    %c0_i32_0 = arith.constant 0 : i32
    %c0_i32_1 = arith.constant 0 : i32
    return %c0_i32, %c0_i32_0 : i32, i32
  }
  func.func @transform_6(%arg0: i32) -> (i32, i32) {
    %c0_i32 = arith.constant 0 : i32
    %c0_i32_0 = arith.constant 0 : i32
    %c0_i32_1 = arith.constant 0 : i32
    return %c0_i32, %c0_i32_0 : i32, i32
  }
  func.func @transform_7(%arg0: i32) -> (i32, i32) {
    %c0_i32 = arith.constant 0 : i32
    %c0_i32_0 = arith.constant 0 : i32
    return %arg0, %c0_i32 : i32, i32
  }
}

</mosaic_0001>

<bundles_post_ra>
// kernel: neural_network_forward.1
= control target key start
LH: loop header
LB: loop body
LE: loop exit
PB: predicated region body
PF: predicated region fallthrough
CT: control target
= control target key end

     0   :  { %vm444_vm0 = vcmask 130048   ;;  %s1384_s0 = inlined_call_operand.vmem [shape: f32[8,784], index: 0, kind: input, shape index: {}]   ;;  %s1385_s1 = inlined_call_operand.vmem [shape: bf16[784,128], index: 1, kind: input, shape index: {}]   ;;  %s1386_s2 = inlined_call_operand.vmem [shape: f32[1,128], index: 2, kind: input, shape index: {}]   ;;  %s1387_s3 = inlined_call_operand.vmem [shape: bf16[128,128], index: 3, kind: input, shape index: {}]   ;;  %s1388_s4 = inlined_call_operand.vmem [shape: f32[1,128], index: 4, kind: input, shape index: {}]   ;;  %s1389_s5 = inlined_call_operand.vmem [shape: bf16[128,128], index: 5, kind: input, shape index: {}]   ;;  %s1390_s6 = inlined_call_operand.vmem [shape: f32[1,128], index: 6, kind: input, shape index: {}]   ;;  %s1391_s7 = inlined_call_operand.vmem [shape: bf16[8,128], index: 7, kind: output, shape index: {}]  }
   0x1   :  { %v1029_v0 = vld [vmem:[%s1385_s1 + $0x38] sm:$0xff]  ;;  %v1028_v4 = vld [vmem:[%s1385_s1 + $0x30] sm:$0xff]  ;;  %v1027_v8 = vld [vmem:[%s1385_s1 + $0x28] sm:$0xff] }
   0x2   :  { %v1037_v1 = vld [vmem:[%s1385_s1 + $0x78] sm:$0xff]  ;;  %448 = vmatpush.bf16.msra.mxu0 %v1029_v0  ;;  %v1036_v5 = vld [vmem:[%s1385_s1 + $0x70] sm:$0xff]  ;;  %v1035_v9 = vld [vmem:[%s1385_s1 + $0x68] sm:$0xff] }
   0x3   :  { %v1045_v2 = vld [vmem:[%s1385_s1 + $0xb8] sm:$0xff]  ;;  %462 = vmatpush.bf16.msra.mxu1 %v1037_v1  ;;  %v1044_v6 = vld [vmem:[%s1385_s1 + $0xb0] sm:$0xff]  ;;  %v1043_v10 = vld [vmem:[%s1385_s1 + $0xa8] sm:$0xff] }
   0x4   :  { %v1053_v3 = vld [vmem:[%s1385_s1 + $0xf8] sm:$0xff]  ;;  %476 = vmatpush.bf16.msra.mxu2 %v1045_v2  ;;  %v1052_v7 = vld [vmem:[%s1385_s1 + $0xf0] sm:$0xff]  ;;  %v1051_v11 = vld [vmem:[%s1385_s1 + $0xe8] sm:$0xff] }
   0x5   :  { %490 = vmatpush.bf16.msra.mxu3 %v1053_v3  ;;  %v1026_v12 = vld [vmem:[%s1385_s1 + $0x20] sm:$0xff]  ;;  %v1025_v16 = vld [vmem:[%s1385_s1 + $0x18] sm:$0xff]  ;;  %v1024_v20 = vld [vmem:[%s1385_s1 + $0x10] sm:$0xff] }
   0x6   :  { %449 = vmatpush.bf16.msra.mxu0 %v1028_v4  ;;  %v1034_v13 = vld [vmem:[%s1385_s1 + $0x60] sm:$0xff]  ;;  %v1033_v17 = vld [vmem:[%s1385_s1 + $0x58] sm:$0xff]  ;;  %v1032_v21 = vld [vmem:[%s1385_s1 + $0x50] sm:$0xff] }
   0x7   :  { %463 = vmatpush.bf16.msra.mxu1 %v1036_v5  ;;  %v1042_v14 = vld [vmem:[%s1385_s1 + $0xa0] sm:$0xff]  ;;  %v1041_v18 = vld [vmem:[%s1385_s1 + $0x98] sm:$0xff]  ;;  %v1040_v22 = vld [vmem:[%s1385_s1 + $0x90] sm:$0xff] }
   0x8   :  { %477 = vmatpush.bf16.msra.mxu2 %v1044_v6  ;;  %v1050_v15 = vld [vmem:[%s1385_s1 + $0xe0] sm:$0xff]  ;;  %v1049_v19 = vld [vmem:[%s1385_s1 + $0xd8] sm:$0xff]  ;;  %v1048_v23 = vld [vmem:[%s1385_s1 + $0xd0] sm:$0xff] }
   0x9   :  { %491 = vmatpush.bf16.msra.mxu3 %v1052_v7  ;;  %v1023_v24 = vld [vmem:[%s1385_s1 + $0x8] sm:$0xff]  ;;  %v1022_v28 = vld [vmem:[%s1385_s1] sm:$0xff]  ;;  %v34_v31 = vld [vmem:[%s1384_s0 + $0x38] sm:$0xff] }
   0xa   :  { %450 = vmatpush.bf16.msra.mxu0 %v1027_v8  ;;  %v1031_v25 = vld [vmem:[%s1385_s1 + $0x48] sm:$0xff]  ;;  %v1030_v29 = vld [vmem:[%s1385_s1 + $0x40] sm:$0xff]  ;;  %v1061_v34 = vld [vmem:[%s1385_s1 + $0x138] sm:$0xff] }
   0xb   :  { %464 = vmatpush.bf16.msra.mxu1 %v1035_v9  ;;  %v1039_v26 = vld [vmem:[%s1385_s1 + $0x88] sm:$0xff]  ;;  %v27_v30 = vld [vmem:[%s1384_s0] sm:$0xff]  ;;  %v1069_v35 = vld [vmem:[%s1385_s1 + $0x178] sm:$0xff] }
   0xc   :  { %478 = vmatpush.bf16.msra.mxu2 %v1043_v10  ;;  %v1047_v27 = vld [vmem:[%s1385_s1 + $0xc8] sm:$0xff]  ;;  %v35_v33 = vld [vmem:[%s1384_s0 + $0x40] sm:$0xff]  ;;  %v29_v38 = vld [vmem:[%s1384_s0 + $0x10] sm:$0xff]  ;;  %v41_v40 = vpack.c.bf16 %v34_v31, %v27_v30 }
   0xd   :  { %492 = vmatpush.bf16.msra.mxu3 %v1051_v11  ;;  %v28_v32 = vld [vmem:[%s1384_s0 + $0x8] sm:$0xff]  ;;  %v1038_v36 = vld [vmem:[%s1385_s1 + $0x80] sm:$0xff]  ;;  %v30_v41 = vld [vmem:[%s1384_s0 + $0x18] sm:$0xff] }
   0xe   :  { %451 = vmatpush.bf16.msra.mxu0 %v1026_v12  ;;  %v1046_v37 = vld [vmem:[%s1385_s1 + $0xc0] sm:$0xff]  ;;  %v36_v39 = vld [vmem:[%s1384_s0 + $0x48] sm:$0xff]  ;;  %v37_v42 = vld [vmem:[%s1384_s0 + $0x50] sm:$0xff]  ;;  %v42_v43 = vpack.c.bf16 %v35_v33, %v28_v32 }
   0xf   :  { %465 = vmatpush.bf16.msra.mxu1 %v1034_v13  ;;  %v1070_v44 = vld [vmem:[%s1385_s1 + $0x180] sm:$0xff]  ;;  %v1060_v45 = vld [vmem:[%s1385_s1 + $0x130] sm:$0xff]  ;;  %v43_v47 = vpack.c.bf16 %v36_v39, %v29_v38  ;;  %v44_v48 = vpack.c.bf16 %v37_v42, %v30_v41  ;;  %v1059_v49 = vld [vmem:[%s1385_s1 + $0x128] sm:$0xff] }
  0x10   :  { %479 = vmatpush.bf16.msra.mxu2 %v1042_v14  ;;  %v1068_v46 = vld [vmem:[%s1385_s1 + $0x170] sm:$0xff]  ;;  %v1067_v50 = vld [vmem:[%s1385_s1 + $0x168] sm:$0xff]  ;;  %v1058_v51 = vld [vmem:[%s1385_s1 + $0x120] sm:$0xff] }
  0x11   :  { %493 = vmatpush.bf16.msra.mxu3 %v1050_v15  ;;  %v1066_v52 = vld [vmem:[%s1385_s1 + $0x160] sm:$0xff]  ;;  %v1057_v53 = vld [vmem:[%s1385_s1 + $0x118] sm:$0xff]  ;;  %v33_v55 = vld [vmem:[%s1384_s0 + $0x30] sm:$0xff] }
  0x12   :  { %452 = vmatpush.bf16.msra.mxu0 %v1025_v16  ;;  %v1065_v54 = vld [vmem:[%s1385_s1 + $0x158] sm:$0xff]  ;;  %v40_v56 = vld [vmem:[%s1384_s0 + $0x68] sm:$0xff]  ;;  %v1056_v57 = vld [vmem:[%s1385_s1 + $0x110] sm:$0xff] }
  0x13   :  { %466 = vmatpush.bf16.msra.mxu1 %v1033_v17  ;;  %v1064_v58 = vld [vmem:[%s1385_s1 + $0x150] sm:$0xff]  ;;  %v47_v59 = vpack.c.bf16 %v40_v56, %v33_v55  ;;  %v1055_v60 = vld [vmem:[%s1385_s1 + $0x108] sm:$0xff]  ;;  %v1054_v62 = vld [vmem:[%s1385_s1 + $0x100] sm:$0xff] }
  0x14   :  { %480 = vmatpush.bf16.msra.mxu2 %v1041_v18  ;;  %v1063_v61 = vld [vmem:[%s1385_s1 + $0x148] sm:$0xff]  ;;  %v1062_v63 = vld [vmem:[%s1385_s1 + $0x140] sm:$0xff]  ;;  %v38_v1 = vld [vmem:[%s1384_s0 + $0x58] sm:$0xff] }
  0x15   :  { %494 = vmatpush.bf16.msra.mxu3 %v1049_v19  ;;  %v31_v0 = vld [vmem:[%s1384_s0 + $0x20] sm:$0xff]  ;;  %v32_v2 = vld [vmem:[%s1384_s0 + $0x28] sm:$0xff]  ;;  %v1078_v6 = vld [vmem:[%s1387_s3 + $0x38] sm:$0xff] }
  0x16   :  { %453 = vmatpush.bf16.msra.mxu0 %v1024_v20  ;;  %v39_v3 = vld [vmem:[%s1384_s0 + $0x60] sm:$0xff]  ;;  %v45_v4 = vpack.c.bf16 %v38_v1, %v31_v0  ;;  %v1077_v7 = vld [vmem:[%s1387_s3 + $0x30] sm:$0xff]  ;;  %v1076_v8 = vld [vmem:[%s1387_s3 + $0x28] sm:$0xff] }
  0x17   :  { %467 = vmatpush.bf16.msra.mxu1 %v1032_v21  ;;  %v46_v5 = vpack.c.bf16 %v39_v3, %v32_v2  ;;  %v1075_v9 = vld [vmem:[%s1387_s3 + $0x20] sm:$0xff]  ;;  %v1074_v10 = vld [vmem:[%s1387_s3 + $0x18] sm:$0xff]  ;;  %v1073_v11 = vld [vmem:[%s1387_s3 + $0x10] sm:$0xff] }
  0x18   :  { %481 = vmatpush.bf16.msra.mxu2 %v1040_v22  ;;  %v1072_v12 = vld [vmem:[%s1387_s3 + $0x8] sm:$0xff]  ;;  %v1071_v16 = vld [vmem:[%s1387_s3] sm:$0xff]  ;;  %v1086_v18 = vld [vmem:[%s1389_s5 + $0x38] sm:$0xff] }
  0x19   :  { %495 = vmatpush.bf16.msra.mxu3 %v1048_v23  ;;  %v1092_v17 = vld [vmem:[%s1386_s2] ss:$0 sm:$0xff]  ;;  %v1085_v20 = vld [vmem:[%s1389_s5 + $0x30] sm:$0xff] }
  0x1a   :  { %454 = vmatpush.bf16.msra.mxu0 %v1023_v24  ;;  %v1093_v55 = vld [vmem:[%s1388_s4] ss:$0 sm:$0xff] }
  0x1b   :  { %468 = vmatpush.bf16.msra.mxu1 %v1031_v25  ;;  %v1084_v25 = vld [vmem:[%s1389_s5 + $0x28] sm:$0xff] }
  0x1c   :  { %482 = vmatpush.bf16.msra.mxu2 %v1039_v26 }
  0x1d   :  { %496 = vmatpush.bf16.msra.mxu3 %v1047_v27 }
  0x1e   :  { %455 = vmatpush.bf16.msra.mxu0 %v1022_v28 }
  0x1f   :  { %469 = vmatpush.bf16.msra.mxu1 %v1030_v29  ;;  %v1083_v29 = vld [vmem:[%s1389_s5 + $0x20] sm:$0xff] }
  0x20   :  { %483 = vmatpush.bf16.msra.mxu2 %v1038_v36 }
  0x21   :  { %497 = vmatpush.bf16.msra.mxu3 %v1046_v37  ;;  %456 = vmatmul.bf16.vlgmr.msra.gmra.mxu0 %v41_v40 }
  0x22   :  { %504 = vmatpush.bf16.msrb.mxu0 %v1061_v34  ;;  %470 = vmatmul.bf16.vlgmr.msra.gmra.mxu1 %v42_v43 }
  0x23   :  { %518 = vmatpush.bf16.msrb.mxu1 %v1069_v35  ;;  %484 = vmatmul.bf16.vlgmr.msra.gmra.mxu2 %v43_v47 }
  0x24   :  { %539 = vmatpush.bf16.msrb.mxu2 %v1070_v44  ;;  %498 = vmatmul.bf16.vlgmr.msra.gmra.mxu3 %v44_v48 }
  0x25   :  { %617 = vmatpush.bf16.msrb.mxu3 %v1078_v6 }
  0x26   :  { %505 = vmatpush.bf16.msrb.mxu0 %v1060_v45 }
  0x27   :  { %519 = vmatpush.bf16.msrb.mxu1 %v1068_v46 }
  0x28   :  { %702 = vmatpush.bf16.msra.mxu2 %v1086_v18 }
  0x29   :  { %618 = vmatpush.bf16.msrb.mxu3 %v1077_v7 }
  0x2a   :  { %506 = vmatpush.bf16.msrb.mxu0 %v1059_v49 }
  0x2b   :  { %520 = vmatpush.bf16.msrb.mxu1 %v1067_v50  ;;  %v1082_v50 = vld [vmem:[%s1389_s5 + $0x18] sm:$0xff] }
  0x2c   :  { %703 = vmatpush.bf16.msra.mxu2 %v1085_v20 }
  0x2d   :  { %619 = vmatpush.bf16.msrb.mxu3 %v1076_v8 }
  0x2e   :  { %507 = vmatpush.bf16.msrb.mxu0 %v1058_v51  ;;  %v1081_v51 = vld [vmem:[%s1389_s5 + $0x10] sm:$0xff] }
  0x2f   :  { %521 = vmatpush.bf16.msrb.mxu1 %v1066_v52  ;;  %v1080_v52 = vld [vmem:[%s1389_s5 + $0x8] sm:$0xff] }
  0x30   :  { %704 = vmatpush.bf16.msra.mxu2 %v1084_v25 }
  0x31   :  { %620 = vmatpush.bf16.msrb.mxu3 %v1075_v9 }
  0x32   :  { %508 = vmatpush.bf16.msrb.mxu0 %v1057_v53  ;;  %v1079_v53 = vld [vmem:[%s1389_s5] sm:$0xff] }
  0x33   :  { %522 = vmatpush.bf16.msrb.mxu1 %v1065_v54  ;;  %957 = vmatmul.msk.bf16.vlgmr.msrb.gmra.mxu2 %vm444_vm0, %v47_v59 }
  0x34   :  { %705 = vmatpush.bf16.msra.mxu2 %v1083_v29 }
  0x35   :  { %621 = vmatpush.bf16.msrb.mxu3 %v1074_v10 }
  0x36   :  { %509 = vmatpush.bf16.msrb.mxu0 %v1056_v57 }
  0x37   :  { %523 = vmatpush.bf16.msrb.mxu1 %v1064_v58 }
  0x38   :  { %706 = vmatpush.bf16.msra.mxu2 %v1082_v50 }
  0x39   :  { %622 = vmatpush.bf16.msrb.mxu3 %v1073_v11 }
  0x3a   :  { %510 = vmatpush.bf16.msrb.mxu0 %v1055_v60 }
  0x3b   :  { %524 = vmatpush.bf16.msrb.mxu1 %v1063_v61 }
  0x3c   :  { %707 = vmatpush.bf16.msra.mxu2 %v1081_v51 }
  0x3d   :  { %623 = vmatpush.bf16.msrb.mxu3 %v1072_v12 }
  0x3e   :  { %511 = vmatpush.bf16.msrb.mxu0 %v1054_v62 }
  0x3f   :  { %525 = vmatpush.bf16.msrb.mxu1 %v1062_v63  ;;  %v1094_v63 = vld [vmem:[%s1390_s6] ss:$0 sm:$0xff] }
  0x40   :  { %708 = vmatpush.bf16.msra.mxu2 %v1080_v52 }
  0x41   :  { %512 = vmatmul.bf16.vlgmr.msrb.gmra.mxu0 %v45_v4  ;;  %624 = vmatpush.bf16.msrb.mxu3 %v1071_v16 }
  0x42   :  { %526 = vmatmul.bf16.vlgmr.msrb.gmra.mxu1 %v46_v5 }
  0x44   :  { %709 = vmatpush.bf16.msra.mxu2 %v1079_v53 }
  0x9e   :  { %v457_v13 = vpop.f32.mrf.mxu0 }
  0x9f   :  { %v471_v14 = vpop.f32.mrf.mxu1  ;;  %v458_v19 = vadd.f32 %v1092_v17, %v457_v13 }
  0xa1   :  { %v472_v24 = vadd.f32 %v471_v14, %v458_v19 }
  0xa6   :  { %v485_v15 = vpop.f32.mrf.mxu2  ;;  %v459_v21 = vpop.f32.mrf.mxu0 }
  0xa7   :  { %v473_v22 = vpop.f32.mrf.mxu1  ;;  %v499_v26 = vpop.f32.mrf.mxu3  ;;  %v460_v27 = vadd.f32 %v1092_v17, %v459_v21  ;;  %v486_v28 = vadd.f32 %v485_v15, %v472_v24 }
  0xa9   :  { %v474_v30 = vadd.f32 %v473_v22, %v460_v27  ;;  %v500_v33 = vadd.f32 %v499_v26, %v486_v28 }
  0xae   :  { %v487_v23 = vpop.f32.mrf.mxu2 }
  0xaf   :  { %v488_v35 = vadd.f32 %v487_v23, %v474_v30  ;;  %v501_v37 = vpop.f32.mrf.mxu3 }
  0xb1   :  { %v502_v38 = vadd.f32 %v501_v37, %v488_v35 }
  0xb6   :  { %v541_v34 = vpop.f32.mrf.mxu2 }
  0xbe   :  { %v513_v31 = vpop.f32.mrf.mxu0  ;;  %v543_v45 = vpop.f32.mrf.mxu2 }
  0xbf   :  { %v527_v32 = vpop.f32.mrf.mxu1  ;;  %v514_v36 = vadd.f32 %v513_v31, %v500_v33 }
  0xc1   :  { %v528_v39 = vadd.f32 %v527_v32, %v514_v36 }
  0xc3   :  { %v542_v43 = vadd.f32 %v541_v34, %v528_v39 }
  0xc5   :  { %v546_v47 = vmax.f32 %v542_v43, 0.0 }
  0xc6   :  { %v515_v40 = vpop.f32.mrf.mxu0 }
  0xc7   :  { %v516_v41 = vadd.f32 %v515_v40, %v502_v38  ;;  %v529_v42 = vpop.f32.mrf.mxu1 }
  0xc9   :  { %v530_v44 = vadd.f32 %v529_v42, %v516_v41 }
  0xcb   :  { %v544_v46 = vadd.f32 %v543_v45, %v530_v44 }
  0xcd   :  { %v547_v48 = vmax.f32 %v544_v46, 0.0 }
  0xcf   :  { %v548_v49 = vpack.c.bf16 %v547_v48, %v546_v47 }
  0xd1   :  { %625 = vmatmul.bf16.vlgmr.msrb.gmra.mxu3 %v548_v49 }
 0x154   :  { %v626_v54 = vpop.f32.mrf.mxu3 }
 0x155   :  { %v627_v56 = vadd.f32 %v1093_v55, %v626_v54 }
 0x157   :  { %v631_v59 = vmax.f32 %v627_v56, 0.0 }
 0x15c   :  { %v628_v57 = vpop.f32.mrf.mxu3 }
 0x15d   :  { %v629_v58 = vadd.f32 %v1093_v55, %v628_v57 }
 0x15f   :  { %v632_v60 = vmax.f32 %v629_v58, 0.0 }
 0x161   :  { %v633_v61 = vpack.c.bf16 %v632_v60, %v631_v59 }
 0x163   :  { %710 = vmatmul.bf16.vlgmr.msra.gmra.mxu2 %v633_v61 }
 0x1e6   :  { %v711_v62 = vpop.f32.mrf.mxu2 }
 0x1e7   :  { %v712_v1 = vadd.f32 %v1094_v63, %v711_v62 }
 0x1ee   :  { %v713_v0 = vpop.f32.mrf.mxu2 }
 0x1ef   :  { %v714_v2 = vadd.f32 %v1094_v63, %v713_v0 }
 0x1f1   :  { %v1090_v3 = vpack.c.bf16 %v714_v2, %v712_v1 }
 0x1f3   :  { %1091 = vst [vmem:[#allocation2] sm:$0xff] %v1090_v3  }
 0x1fa   :  { %v738_v4 = vld [vmem:[#allocation2] sm:$0xf] }
 0x1fb   :  { %739 = vst [vmem:[%s1391_s7] sm:$0xf] %v738_v4 }

</bundles_post_ra>
